<compile_context>
chip_gen: v7x
topology: tpu7x:2x2x1
jax: 0.10.0
libtpu: 0.0.40
codegen_flags: <defaults>
</compile_context>

<pallas_src>
import functools

import jax
import jax.numpy as jnp
from jax.experimental import pallas as pl
from jax.experimental.pallas import tpu as pltpu


def _round_up(x, m):
    return (x + m - 1) // m * m


def _cls_regress_kernel(x_ref, w_ref, b_ref, cls_ref, reg_ref, *, cls_pad):
    # One fused matmul for both heads; f32 accumulation on the MXU.
    fused = jnp.dot(x_ref[...], w_ref[...],
                    preferred_element_type=jnp.float32) + b_ref[...]

    # cls branch: softmax over the (lane-aligned, padded) cls block.
    # Padded columns carry a -1e30 bias -> exp underflows to 0, so the real
    # probabilities are unaffected.
    logits = fused[:, :cls_pad]
    m = jnp.max(logits, axis=1, keepdims=True)
    e = jnp.exp(logits - m)
    denom = jnp.sum(e, axis=1, keepdims=True)
    cls_ref[...] = (e * pl.reciprocal(denom)).astype(cls_ref.dtype)

    # reg branch: plain linear (lane-aligned slice, lane-dense store).
    reg_ref[...] = fused[:, cls_pad:].astype(reg_ref.dtype)


def cls_regress_outputs_forward(x, cls_w, cls_b, reg_w, reg_b, *, tile_n=256):
    """x: (N, dim_in) or (N, dim_in, 1, 1).
    Weights are pre-transposed: cls_w (dim_in, dim_out), reg_w (dim_in, 4*dim_out);
    biases (dim_out,), (4*dim_out,)."""
    if x.ndim == 4:
        x = jnp.squeeze(jnp.squeeze(x, axis=3), axis=2)   # glue, like torch squeeze

    n, dim_in = x.shape
    dim_out = cls_w.shape[1]
    reg_out = reg_w.shape[1]

    lane = 128
    cls_pad = _round_up(dim_out, lane)
    reg_pad = _round_up(reg_out, lane)
    fused_out = cls_pad + reg_pad

    # Fuse + lane-pad the weights once (wrapper-side glue, cheap vs. matmul).
    w = jnp.zeros((dim_in, fused_out), dtype=cls_w.dtype)
    w = w.at[:, :dim_out].set(cls_w)
    w = w.at[:, cls_pad:cls_pad + reg_out].set(reg_w)

    # Fused bias in f32; padded cls columns get -1e30 so softmax ignores them.
    b = jnp.zeros((1, fused_out), dtype=jnp.float32)
    b = b.at[:, :dim_out].set(cls_b.astype(jnp.float32))
    b = b.at[:, dim_out:cls_pad].set(jnp.float32(-1e30))
    b = b.at[:, cls_pad:cls_pad + reg_out].set(reg_b.astype(jnp.float32))

    # Tile over N; pad N so every grid block is full (sublane multiple of 8).
    tile_n = max(8, min(tile_n, _round_up(n, 8)))
    n_pad = _round_up(n, tile_n)
    if n_pad != n:
        x = jnp.pad(x, ((0, n_pad - n), (0, 0)))
    grid = (pl.cdiv(n_pad, tile_n),)

    itemsize = jnp.dtype(x.dtype).itemsize
    cost = pl.CostEstimate(
        flops=2 * n_pad * dim_in * fused_out,
        transcendentals=n_pad * cls_pad,
        bytes_accessed=itemsize * (n_pad * dim_in + dim_in * fused_out
                                   + n_pad * fused_out),
    )

    kernel = functools.partial(_cls_regress_kernel, cls_pad=cls_pad)

    cls_p, reg_p = pl.pallas_call(
        kernel,
        out_shape=(
            jax.ShapeDtypeStruct((n_pad, cls_pad), x.dtype),
            jax.ShapeDtypeStruct((n_pad, reg_pad), x.dtype),
        ),
        grid=grid,
        in_specs=[
            # x tile marches over the batch; weight/bias stay resident.
            pl.BlockSpec((tile_n, dim_in), lambda i: (i, 0)),
            pl.BlockSpec((dim_in, fused_out), lambda i: (0, 0)),
            pl.BlockSpec((1, fused_out), lambda i: (0, 0)),
        ],
        out_specs=(
            pl.BlockSpec((tile_n, cls_pad), lambda i: (i, 0)),
            pl.BlockSpec((tile_n, reg_pad), lambda i: (i, 0)),
        ),
        compiler_params=pltpu.CompilerParams(
            dimension_semantics=("parallel",),          # 2 TCs on v7x
            vmem_limit_bytes=48 * 1024 * 1024,          # fits v5e/v6e/v7x
        ),
        cost_estimate=cost,
    )(x, w, b)

    # Strip batch + lane padding.
    return cls_p[:n, :dim_out], reg_p[:n, :reg_out]


def init_params(key, dim_in, dim_out, dtype=jnp.float32):
    """Deterministic init matching the non-Kaiming branch of _init_weights:
    cls weight ~ N(0, 0.01), reg weight ~ N(0, 0.001), biases = 0."""
    k1, k2 = jax.random.split(key)
    # PyTorch weight is (out, in); store transposed (in, out) for the kernel.
    cls_w = (0.01 * jax.random.normal(k1, (dim_out, dim_in), dtype)).T
    reg_w = (0.001 * jax.random.normal(k2, (4 * dim_out, dim_in), dtype)).T
    cls_b = jnp.zeros((dim_out,), dtype)
    reg_b = jnp.zeros((4 * dim_out,), dtype)
    return cls_w, cls_b, reg_w, reg_b


if __name__ == "__main__":
    key = jax.random.PRNGKey(0)
    kx, kp = jax.random.split(key)

    N, DIM_IN, DIM_OUT = 8, 32, 8
    # Module accepts 4D (N, C, 1, 1) RoI-pooled features and squeezes them.
    x = jax.random.normal(kx, (N, DIM_IN, 1, 1), jnp.float32)

    cls_w, cls_b, reg_w, reg_b = init_params(kp, DIM_IN, DIM_OUT)

    cls_score, reg_score = cls_regress_outputs_forward(x, cls_w, cls_b, reg_w, reg_b)
    jax.block_until_ready((cls_score, reg_score))

    # Sanity-check against plain-JAX reference.
    x2 = x.reshape(N, DIM_IN)
    ref_cls = jax.nn.softmax(x2 @ cls_w + cls_b, axis=1)
    ref_reg = x2 @ reg_w + reg_b
    assert cls_score.shape == (N, DIM_OUT)
    assert reg_score.shape == (N, 4 * DIM_OUT)
    assert jnp.allclose(cls_score, ref_cls, atol=1e-5)
    assert jnp.allclose(reg_score, ref_reg, atol=1e-5)
    assert jnp.allclose(jnp.sum(cls_score, axis=1), 1.0, atol=1e-5)

    print("KERNEL_OK")
</pallas_src>

<mosaic_0001>
module attributes {stable_mosaic.version = 11 : i64} {
  func.func @_cls_regress_kernel(%arg0: i32, %arg1: memref<8x32xf32, #tpu.memory_space<vmem>>, %arg2: memref<32x256xf32, #tpu.memory_space<vmem>>, %arg3: memref<1x256xf32, #tpu.memory_space<vmem>>, %arg4: memref<8x128xf32, #tpu.memory_space<vmem>>, %arg5: memref<8x128xf32, #tpu.memory_space<vmem>>) attributes {dimension_semantics = [#tpu.dimension_semantics<parallel>], iteration_bounds = array<i64: 1>, scalar_prefetch = 0 : i64, scratch_operands = 0 : i64, tpu.core_type = #tpu.core_type<tc>, window_params = [{transform_indices = @transform_0, window_bounds = array<i64: 8, 32>}, {pipeline_mode = #tpu.pipeline_mode<synchronous>, transform_indices = @transform_1, window_bounds = array<i64: 32, 256>}, {pipeline_mode = #tpu.pipeline_mode<synchronous>, transform_indices = @transform_2, window_bounds = array<i64: 1, 256>}, {transform_indices = @transform_3, window_bounds = array<i64: 8, 128>}, {transform_indices = @transform_4, window_bounds = array<i64: 8, 128>}]} {
    %c0 = arith.constant 0 : index
    %c0_0 = arith.constant 0 : index
    %0 = vector.load %arg1[%c0, %c0_0] : memref<8x32xf32, #tpu.memory_space<vmem>>, vector<8x32xf32>
    %c0_1 = arith.constant 0 : index
    %c0_2 = arith.constant 0 : index
    %1 = vector.load %arg2[%c0_1, %c0_2] : memref<32x256xf32, #tpu.memory_space<vmem>>, vector<32x256xf32>
    %cst = arith.constant dense<0.000000e+00> : vector<8x256xf32>
    %2 = tpu.matmul %0, %1, %cst {dimension_numbers = #tpu.dot_dimension_numbers<[1], [0], [0], [1], [0, 0, 1, 1], [], []>} : vector<8x32xf32>, vector<32x256xf32>, vector<8x256xf32> -> vector<8x256xf32>
    %c0_3 = arith.constant 0 : index
    %c0_4 = arith.constant 0 : index
    %3 = vector.load %arg3[%c0_3, %c0_4] : memref<1x256xf32, #tpu.memory_space<vmem>>, vector<1x256xf32>
    %4 = vector.broadcast %3 : vector<1x256xf32> to vector<8x256xf32>
    %5 = arith.addf %2, %4 : vector<8x256xf32>
    %6 = vector.extract_strided_slice %5 {offsets = [0, 0], sizes = [8, 128], strides = [1, 1]} : vector<8x256xf32> to vector<8x128xf32>
    %cst_5 = arith.constant dense<0xFF800000> : vector<8xf32>
    %7 = vector.multi_reduction <maximumf>, %6, %cst_5 [1] : vector<8x128xf32> to vector<8xf32>
    %8 = vector.shape_cast %7 : vector<8xf32> to vector<8x1xf32>
    %9 = vector.broadcast %8 : vector<8x1xf32> to vector<8x128xf32>
    %10 = arith.subf %6, %9 : vector<8x128xf32>
    %11 = math.exp %10 : vector<8x128xf32>
    %cst_6 = arith.constant dense<0.000000e+00> : vector<8xf32>
    %12 = vector.multi_reduction <add>, %11, %cst_6 [1] : vector<8x128xf32> to vector<8xf32>
    %13 = vector.shape_cast %12 : vector<8xf32> to vector<8x1xf32>
    %14 = tpu.reciprocal %13 : vector<8x1xf32> -> vector<8x1xf32>
    %15 = vector.broadcast %14 : vector<8x1xf32> to vector<8x128xf32>
    %16 = arith.mulf %11, %15 : vector<8x128xf32>
    %c0_7 = arith.constant 0 : index
    %c0_8 = arith.constant 0 : index
    %17 = vector.load %arg4[%c0_7, %c0_8] : memref<8x128xf32, #tpu.memory_space<vmem>>, vector<8x128xf32>
    tpu.vector_store %arg4[%c0_7, %c0_8], %16 {strides = array<i32>} : memref<8x128xf32, #tpu.memory_space<vmem>>, vector<8x128xf32>,
    %18 = vector.extract_strided_slice %5 {offsets = [0, 128], sizes = [8, 128], strides = [1, 1]} : vector<8x256xf32> to vector<8x128xf32>
    %c0_9 = arith.constant 0 : index
    %c0_10 = arith.constant 0 : index
    %19 = vector.load %arg5[%c0_9, %c0_10] : memref<8x128xf32, #tpu.memory_space<vmem>>, vector<8x128xf32>
    tpu.vector_store %arg5[%c0_9, %c0_10], %18 {strides = array<i32>} : memref<8x128xf32, #tpu.memory_space<vmem>>, vector<8x128xf32>,
    return
  }
  func.func @transform_0(%arg0: i32) -> (i32, i32) {
    %c0_i32 = arith.constant 0 : i32
    %c0_i32_0 = arith.constant 0 : i32
    return %arg0, %c0_i32 : i32, i32
  }
  func.func @transform_1(%arg0: i32) -> (i32, i32) {
    %c0_i32 = arith.constant 0 : i32
    %c0_i32_0 = arith.constant 0 : i32
    %c0_i32_1 = arith.constant 0 : i32
    return %c0_i32, %c0_i32_0 : i32, i32
  }
  func.func @transform_2(%arg0: i32) -> (i32, i32) {
    %c0_i32 = arith.constant 0 : i32
    %c0_i32_0 = arith.constant 0 : i32
    %c0_i32_1 = arith.constant 0 : i32
    return %c0_i32, %c0_i32_0 : i32, i32
  }
  func.func @transform_3(%arg0: i32) -> (i32, i32) {
    %c0_i32 = arith.constant 0 : i32
    %c0_i32_0 = arith.constant 0 : i32
    return %arg0, %c0_i32 : i32, i32
  }
  func.func @transform_4(%arg0: i32) -> (i32, i32) {
    %c0_i32 = arith.constant 0 : i32
    %c0_i32_0 = arith.constant 0 : i32
    return %arg0, %c0_i32 : i32, i32
  }
}

</mosaic_0001>

<bundles_post_ra>
// kernel: tpu_custom_call.1
= control target key start
LH: loop header
LB: loop body
LE: loop exit
PB: predicated region body
PF: predicated region fallthrough
CT: control target
= control target key end

     0   :  { %10 = vsyncpa [#allocation3], 0  ;;  %s387_s0 = inlined_call_operand.hbm [shape: f32[8,32], index: 0, kind: input, shape index: {}]   ;;  %s388_s1 = inlined_call_operand.hbm [shape: f32[32,256], index: 1, kind: input, shape index: {}]   ;;  %s389_s2 = inlined_call_operand.vmem [shape: f32[1,256], index: 2, kind: input, shape index: {}]   ;;  %s390_s3 = inlined_call_operand.hbm [shape: f32[8,128], index: 3, kind: output, shape index: {0}]   ;;  %s391_s4 = inlined_call_operand.hbm [shape: f32[8,128], index: 4, kind: output, shape index: {1}]  }
   0x1   :  { %11 = vsyncpa [#allocation6], 0 }
   0x2   :  { %12 = vsyncpa [#allocation4], 0 }
   0x3   :  { %13 = vsyncpa [#allocation9], 0  ;;  %s297_s15 = smov [#allocation2]   ;;  %s298_s17 = smov [#allocation5]  }
   0x4   :  { %s20_s16 = sshll.u32 %s297_s15, 4  ;;  %s29_s18 = sshll.u32 %s298_s17, 4  ;;  %s21_s16 = int_to_ptr.vmem [resolvable:$true] %s20_s16  ;;  %s329_s18 = int_to_ptr.vmem [resolvable:$true] %s29_s18 }
   0x5   :  { %s201_s21 = scalar_lea.hbm %s387_s0, 128 }
   0x6   :  { %p202_p0 = scmp.ne.s32.totalorder %s387_s0, %s201_s21  ;;  %p205_p1 = scmp.lt.u32.totalorder %s201_s21, %s387_s0 }
   0x8   :  { %p207_p2 = pnand %p205_p1, %p202_p0 }
   0xa   :  { %210 = shalt.err (!%p207_p2)
}
   0xb   :  { %s211_s26 = scalar_lea.vmem %s21_s16, 128  ;;  %p216_p4 = scmp.lt.s32.totalorder %s21_s16, %s21_s16 }
   0xc   :  { %p212_p3 = scmp.ne.s32.totalorder %s21_s16, %s211_s26  ;;  %p217_p5 = scmp.lt.s32.totalorder %s211_s26, %s211_s26 }
   0xe   :  { %p218_p6 = por %p217_p5, %p216_p4 }
  0x10   :  { %p219_p7 = pnand %p218_p6, %p212_p3 }
  0x12   :  { %222 = shalt.err (!%p219_p7)
}
  0x13   :  { %23 = dma.hbm_to_vmem [thread:$0]  %s387_s0, 128, %s21_s16, [#allocation3]  }
  0x14   :  { %s223_s5 = scalar_lea.hbm %s388_s1, 1024 }
  0x15   :  { %p224_p8 = scmp.ne.s32.totalorder %s388_s1, %s223_s5  ;;  %p227_p9 = scmp.lt.u32.totalorder %s223_s5, %s388_s1 }
  0x17   :  { %p229_p10 = pnand %p227_p9, %p224_p8 }
  0x19   :  { %232 = shalt.err (!%p229_p10)
}
  0x1a   :  { %s233_s10 = scalar_lea.vmem %s329_s18, 1024  ;;  %p238_p12 = scmp.lt.s32.totalorder %s329_s18, %s329_s18 }
  0x1b   :  { %p234_p11 = scmp.ne.s32.totalorder %s329_s18, %s233_s10  ;;  %p239_p13 = scmp.lt.s32.totalorder %s233_s10, %s233_s10 }
  0x1d   :  { %p240_p0 = por %p239_p13, %p238_p12 }
  0x1f   :  { %p241_p1 = pnand %p240_p0, %p234_p11 }
  0x21   :  { %244 = shalt.err (!%p241_p1)
}
  0x22   :  { %s299_s0 = smov 256   ;;  %s300_s11 = smov 16  }
  0x23   :  { %35 = dma.hbm_to_vmem [thread:$0]  %s388_s1, 1024, %s329_s18, [#allocation6], %s299_s0, %s299_s0, %s300_s11  }
  0x24   :  { %289 = dma.done.wait [#allocation3], 128  }
  0x25   :  { %290 = vsyncadd [#allocation3], 4294967168 }
  0x26   :  { %291 = dma.done.wait [#allocation6], 1024  }
  0x27   :  { %292 = vsyncadd [#allocation6], 4294966272  ;;  %v301_v0 = vmov 0.0   ;;  %v46_v1 = vld [vmem:[#allocation5 + $0x8] sm:$0xff]  ;;  %v48_v2 = vld [vmem:[#allocation5 + $0x18] sm:$0xff]  ;;  %vm65_vm0 = vcmask 261120   ;;  %v55_v14 = vlaneseq }
  0x28   :  { %133 = vmatprep.mubr.f32.mxu0 %v301_v0  ;;  %v45_v3 = vld [vmem:[#allocation5] sm:$0xff]  ;;  %v182_v4 = vpack.c.bf16 %v48_v2, %v46_v1  ;;  %v47_v5 = vld [vmem:[#allocation5 + $0x10] sm:$0xff]  ;;  %v50_v6 = vld [vmem:[#allocation5 + $0x28] sm:$0xff]  ;;  %s302_s15 = smov [#allocation8]  }
  0x29   :  { %v52_v7 = vld [vmem:[#allocation5 + $0x38] sm:$0xff]  ;;  %v184_v8 = vpack.c.bf16 %v47_v5, %v45_v3  ;;  %v49_v10 = vld [vmem:[#allocation5 + $0x20] sm:$0xff]  ;;  %v51_v11 = vld [vmem:[#allocation5 + $0x30] sm:$0xff]  ;;  %v56_v15 = vshrl.u32 %v55_v14, 7  ;;  %s167_s16 = sshll.u32 %s302_s15, 4  ;;  %s168_s16 = int_to_ptr.vmem [resolvable:$true] %s167_s16 }
  0x2a   :  { %v186_v9 = vpack.c.bf16 %v52_v7, %v50_v6  ;;  %183 = vmatprep.subr.bf16.mxu0 %v182_v4  ;;  %v188_v12 = vpack.c.bf16 %v51_v11, %v49_v10  ;;  %v44_v13 = vld [vmem:[#allocation2] sm:$0xff]  ;;  %s245_s17 = scalar_lea.vmem %s168_s16, 128  ;;  %p250_p3 = scmp.lt.s32.totalorder %s168_s16, %s168_s16 }
  0x2b   :  { %185 = vmatpush1.bf16.msra.mxu0 %v184_v8  ;;  %v57_v16 = vsub.s32 0, %v56_v15  ;;  %v53_v17 = vld [vmem:[%s389_s2] sm:$0x3]  ;;  %v61_v18 = vsub.s32 1, %v56_v15  ;;  %p246_p2 = scmp.ne.s32.totalorder %s168_s16, %s245_s17  ;;  %p251_p4 = scmp.lt.s32.totalorder %s245_s17, %s245_s17 }
  0x2c   :  { %187 = vmatprep.subr.bf16.mxu0 %v186_v9 }
  0x2d   :  { %v58_v19 = vrot.slane %v53_v17, %v57_v16  ;;  %v62_v20 = vrot.slane %v53_v17, %v61_v18  ;;  %p252_p5 = por %p251_p4, %p250_p3 }
  0x2f   :  { %189 = vmatpush1.bf16.msra.mxu0 %v188_v12  ;;  %p253_p6 = pnand %p252_p5, %p246_p2 }
  0x32   :  { %181 = vmatmul.mubr.msk.f32.vlgmr.msra.gmra.mrb[0].mxu0 %vm65_vm0, %v44_v13 }
 0x105   :  { %v135_v21 = vpop.f32.mrb[0].mxu0 }
 0x106   :  { %v136_v22 = vadd.f32 %v135_v21, %v58_v19  ;;  %v137_v23 = vpop.f32.mrb[1].mxu0 }
 0x107   :  { %v138_v24 = vadd.f32 %v137_v23, %v62_v20 }
 0x108   :  { %140 = vmax.xlane.f32.xlu0 %v136_v22 }
 0x109   :  { %150 = vst [vmem:[#allocation8] sm:$0xff] %v138_v24 }
 0x195   :  { %v141_v25 = vpop.xlane.xlu0 %140 }
 0x196   :  { %v142_v26 = vsub.f32 %v136_v22, %v141_v25 }
 0x198   :  { %v143_v27 = vmul.f32 1.442695, %v142_v26 }
 0x19a   :  { %197 = vpow2.f32 %v143_v27 }
 0x1a4   :  { %v198_v28 = vpop.eup %197 }
 0x1a5   :  { %145 = vadd.xlane.f32.xlu0 %v198_v28 }
 0x1a6   :  { %256 = shalt.err (!%p253_p6)
}
 0x1a7   :  { %s257_s19 = scalar_lea.hbm %s391_s4, 128 }
 0x1a8   :  { %p258_p7 = scmp.ne.s32.totalorder %s391_s4, %s257_s19  ;;  %p261_p8 = scmp.lt.u32.totalorder %s257_s19, %s391_s4 }
 0x1aa   :  { %p263_p9 = pnand %p261_p8, %p258_p7 }
 0x1ac   :  { %266 = shalt.err (!%p263_p9)
}
 0x1ad   :  { %170 = dma.vmem_to_hbm [thread:$0]  %s168_s16, 128, %s391_s4, [#allocation9]  }
 0x1ae   :  { %s303_s26 = smov [#allocation7]  }
 0x1af   :  { %s157_s27 = sshll.u32 %s303_s26, 4  ;;  %s158_s27 = int_to_ptr.vmem [resolvable:$true] %s157_s27 }
 0x1b0   :  { %s267_s28 = scalar_lea.vmem %s158_s27, 128  ;;  %p272_p11 = scmp.lt.s32.totalorder %s158_s27, %s158_s27 }
 0x1b1   :  { %p268_p10 = scmp.ne.s32.totalorder %s158_s27, %s267_s28  ;;  %p273_p12 = scmp.lt.s32.totalorder %s267_s28, %s267_s28 }
 0x1b3   :  { %p274_p13 = por %p273_p12, %p272_p11 }
 0x1b5   :  { %p275_p0 = pnand %p274_p13, %p268_p10 }
 0x232   :  { %v146_v29 = vpop.xlane.xlu0 %145 }
 0x233   :  { %199 = vrcp.f32 %v146_v29 }
 0x23d   :  { %v200_v30 = vpop.eup %199 }
 0x23e   :  { %v148_v31 = vmul.f32 %v200_v30, %v198_v28 }
 0x240   :  { %149 = vst [vmem:[#allocation7] sm:$0xff] %v148_v31 }
 0x241   :  { %278 = shalt.err (!%p275_p0)
}
 0x242   :  { %s279_s5 = scalar_lea.hbm %s390_s3, 128 }
 0x243   :  { %p280_p1 = scmp.ne.s32.totalorder %s390_s3, %s279_s5  ;;  %p283_p2 = scmp.lt.u32.totalorder %s279_s5, %s390_s3 }
 0x245   :  { %p285_p3 = pnand %p283_p2, %p280_p1 }
 0x247   :  { %288 = shalt.err (!%p285_p3)
}
 0x248   :  { %160 = dma.vmem_to_hbm [thread:$0]  %s158_s27, 128, %s390_s3, [#allocation4]  }
 0x249   :  { %293 = dma.done.wait [#allocation4], 128  }
 0x24a   :  { %294 = vsyncadd [#allocation4], 4294967168 }
 0x24b   :  { %295 = dma.done.wait [#allocation9], 128  }
 0x24c   :  { %296 = vsyncadd [#allocation9], 4294967168 }
 0x24d   :  { %177 = vsyncpa [#allocation3], 1 }
 0x24e   :  { %178 = vsyncpa [#allocation6], 1 }
 0x24f   :  { %179 = vsyncpa [#allocation4], 1 }
 0x250   :  { %180 = vsyncpa [#allocation9], 1 }

</bundles_post_ra>
